<compile_context>
chip_gen: v5e
topology: v5e:2x2
jax: 0.10.0
libtpu: 0.0.40
codegen_flags: <defaults>
</compile_context>

<pallas_src>
import functools

import jax
import jax.numpy as jnp
from jax.experimental import pallas as pl
from jax.experimental.pallas import tpu as pltpu


def _round_up(n, m):
    return ((n + m - 1) // m) * m


def _choose_batch_tile(batch, block_b):
    """Sublane-aligned batch tile.

    For large batches aim for ~16 grid steps (feeds both v7x TensorCores and the
    software pipeline), never below 256 rows (amortizes ~0.35 us per-step
    overhead) and never above `block_b` (VMEM headroom, incl. v5e's 16 MiB
    scoped default).  Small batches get a single tile.
    """
    if batch <= 256:
        return _round_up(batch, 8)
    target = _round_up(-(-batch // 16), 8)
    tb = max(256, min(block_b, target))
    return min(tb, _round_up(batch, 8))


def mlp_kernel(x_ref, w1_ref, b1_ref, w2_ref, b2_ref, w3_ref, b3_ref, o_ref):
    x = x_ref[...]
    h1 = jnp.dot(x, w1_ref[...], preferred_element_type=jnp.float32) + b1_ref[...]
    h1 = jnp.maximum(h1, 0.0)
    h2 = jnp.dot(h1, w2_ref[...], preferred_element_type=jnp.float32) + b2_ref[...]
    h2 = jnp.maximum(h2, 0.0)
    h3 = jnp.dot(h2, w3_ref[...], preferred_element_type=jnp.float32) + b3_ref[...]
    # ReLU followed by clamp(min=0, max=1) == clip(., 0, 1).
    o_ref[...] = jnp.clip(h3, 0.0, 1.0).astype(o_ref.dtype)


@functools.partial(jax.jit, static_argnames=("block_b",))
def mlp_forward(x, w1, b1, w2, b2, w3, b3, *, block_b=1024):
    """x: (B, in_features).  Weights: (in_features, out_features); biases: (1, N)."""
    B, in_size = x.shape
    hidden = w1.shape[1]
    out_size = w3.shape[1]

    tb = _choose_batch_tile(B, block_b)
    grid = (pl.cdiv(B, tb),)

    resident = lambda i: (0, 0)  # constant index_map: fetched once, stays in VMEM

    flops = 2 * B * (in_size * hidden + hidden * hidden + hidden * out_size)
    bytes_accessed = 4 * (
        B * in_size + B * out_size                       # activations in/out
        + in_size * hidden + hidden * hidden + hidden * out_size  # weights
        + 2 * hidden + out_size                          # biases
    )

    return pl.pallas_call(
        mlp_kernel,
        out_shape=jax.ShapeDtypeStruct((B, out_size), jnp.float32),
        grid_spec=pltpu.PrefetchScalarGridSpec(
            num_scalar_prefetch=0,
            grid=grid,
            in_specs=[
                pl.BlockSpec((tb, in_size), lambda i: (i, 0)),   # x tile (pipelined)
                pl.BlockSpec((in_size, hidden), resident),       # w1
                pl.BlockSpec((1, hidden), resident),             # b1
                pl.BlockSpec((hidden, hidden), resident),        # w2
                pl.BlockSpec((1, hidden), resident),             # b2
                pl.BlockSpec((hidden, out_size), resident),      # w3
                pl.BlockSpec((1, out_size), resident),           # b3
            ],
            # Last dim == full array dim, so the narrow (e.g. 32-lane) output is
            # legal; masked stores hide under the DMA in this mem-bound kernel.
            out_specs=pl.BlockSpec((tb, out_size), lambda i: (i, 0)),
        ),
        compiler_params=pltpu.CompilerParams(
            dimension_semantics=("parallel",),  # batch tiles shard across TCs (v7x)
        ),
        cost_estimate=pl.CostEstimate(
            flops=flops, transcendentals=0, bytes_accessed=bytes_accessed
        ),
    )(x, w1, b1, w2, b2, w3, b3)


def init_params(key, input_size, hidden_size, output_size):
    # PyTorch nn.Linear-style uniform(-1/sqrt(fan_in), 1/sqrt(fan_in)), fp32.
    def linear_init(k, fan_in, fan_out):
        kw, kb = jax.random.split(k)
        bound = 1.0 / jnp.sqrt(fan_in)
        w = jax.random.uniform(kw, (fan_in, fan_out), jnp.float32, -bound, bound)
        b = jax.random.uniform(kb, (1, fan_out), jnp.float32, -bound, bound)
        return w, b

    k1, k2, k3 = jax.random.split(key, 3)
    w1, b1 = linear_init(k1, input_size, hidden_size)
    w2, b2 = linear_init(k2, hidden_size, hidden_size)
    w3, b3 = linear_init(k3, hidden_size, output_size)
    return w1, b1, w2, b2, w3, b3


if __name__ == "__main__":
    input_size, hidden_size, output_size = 64, 128, 32
    batch = 8

    key = jax.random.PRNGKey(0)
    kx, kp = jax.random.split(key)
    x = jax.random.normal(kx, (batch, input_size), dtype=jnp.float32)
    params = init_params(kp, input_size, hidden_size, output_size)

    out = mlp_forward(x, *params)
    jax.block_until_ready(out)
    assert out.shape == (batch, output_size), out.shape

    # Pure-JAX reference (same f32-operand math / default TPU matmul precision).
    w1, b1, w2, b2, w3, b3 = params
    ref = jnp.maximum(x @ w1 + b1, 0.0)
    ref = jnp.maximum(ref @ w2 + b2, 0.0)
    ref = jnp.clip(ref @ w3 + b3, 0.0, 1.0)
    max_err = float(jnp.max(jnp.abs(out - ref)))
    assert jnp.allclose(out, ref, atol=1e-3, rtol=1e-3), max_err

    # Output range sanity (clamp semantics).
    assert float(jnp.min(out)) >= 0.0 and float(jnp.max(out)) <= 1.0

    print("KERNEL_OK")
</pallas_src>

<mosaic_0001>
module attributes {stable_mosaic.version = 11 : i64} {
  func.func @mlp_kernel(%arg0: i32, %arg1: memref<8x64xf32, #tpu.memory_space<vmem>>, %arg2: memref<64x128xf32, #tpu.memory_space<vmem>>, %arg3: memref<1x128xf32, #tpu.memory_space<vmem>>, %arg4: memref<128x128xf32, #tpu.memory_space<vmem>>, %arg5: memref<1x128xf32, #tpu.memory_space<vmem>>, %arg6: memref<128x32xf32, #tpu.memory_space<vmem>>, %arg7: memref<1x32xf32, #tpu.memory_space<vmem>>, %arg8: memref<8x32xf32, #tpu.memory_space<vmem>>) attributes {dimension_semantics = [#tpu.dimension_semantics<parallel>], iteration_bounds = array<i64: 1>, scalar_prefetch = 0 : i64, scratch_operands = 0 : i64, tpu.core_type = #tpu.core_type<tc>, window_params = [{transform_indices = @transform_0, window_bounds = array<i64: 8, 64>}, {pipeline_mode = #tpu.pipeline_mode<synchronous>, transform_indices = @transform_1, window_bounds = array<i64: 64, 128>}, {pipeline_mode = #tpu.pipeline_mode<synchronous>, transform_indices = @transform_2, window_bounds = array<i64: 1, 128>}, {pipeline_mode = #tpu.pipeline_mode<synchronous>, transform_indices = @transform_3, window_bounds = array<i64: 128, 128>}, {pipeline_mode = #tpu.pipeline_mode<synchronous>, transform_indices = @transform_4, window_bounds = array<i64: 1, 128>}, {pipeline_mode = #tpu.pipeline_mode<synchronous>, transform_indices = @transform_5, window_bounds = array<i64: 128, 32>}, {pipeline_mode = #tpu.pipeline_mode<synchronous>, transform_indices = @transform_6, window_bounds = array<i64: 1, 32>}, {transform_indices = @transform_7, window_bounds = array<i64: 8, 32>}]} {
    %c0 = arith.constant 0 : index
    %c0_0 = arith.constant 0 : index
    %0 = vector.load %arg1[%c0, %c0_0] : memref<8x64xf32, #tpu.memory_space<vmem>>, vector<8x64xf32>
    %c0_1 = arith.constant 0 : index
    %c0_2 = arith.constant 0 : index
    %1 = vector.load %arg2[%c0_1, %c0_2] : memref<64x128xf32, #tpu.memory_space<vmem>>, vector<64x128xf32>
    %cst = arith.constant dense<0.000000e+00> : vector<8x128xf32>
    %2 = tpu.matmul %0, %1, %cst {dimension_numbers = #tpu.dot_dimension_numbers<[1], [0], [0], [1], [0, 0, 1, 1], [], []>} : vector<8x64xf32>, vector<64x128xf32>, vector<8x128xf32> -> vector<8x128xf32>
    %c0_3 = arith.constant 0 : index
    %c0_4 = arith.constant 0 : index
    %3 = vector.load %arg3[%c0_3, %c0_4] : memref<1x128xf32, #tpu.memory_space<vmem>>, vector<1x128xf32>
    %4 = vector.broadcast %3 : vector<1x128xf32> to vector<8x128xf32>
    %5 = arith.addf %2, %4 : vector<8x128xf32>
    %cst_5 = arith.constant 0.000000e+00 : f32
    %6 = vector.broadcast %cst_5 : f32 to vector<8x128xf32>
    %7 = arith.maximumf %5, %6 : vector<8x128xf32>
    %c0_6 = arith.constant 0 : index
    %c0_7 = arith.constant 0 : index
    %8 = vector.load %arg4[%c0_6, %c0_7] : memref<128x128xf32, #tpu.memory_space<vmem>>, vector<128x128xf32>
    %cst_8 = arith.constant dense<0.000000e+00> : vector<8x128xf32>
    %9 = tpu.matmul %7, %8, %cst_8 {dimension_numbers = #tpu.dot_dimension_numbers<[1], [0], [0], [1], [0, 0, 1, 1], [], []>} : vector<8x128xf32>, vector<128x128xf32>, vector<8x128xf32> -> vector<8x128xf32>
    %c0_9 = arith.constant 0 : index
    %c0_10 = arith.constant 0 : index
    %10 = vector.load %arg5[%c0_9, %c0_10] : memref<1x128xf32, #tpu.memory_space<vmem>>, vector<1x128xf32>
    %11 = vector.broadcast %10 : vector<1x128xf32> to vector<8x128xf32>
    %12 = arith.addf %9, %11 : vector<8x128xf32>
    %cst_11 = arith.constant 0.000000e+00 : f32
    %13 = vector.broadcast %cst_11 : f32 to vector<8x128xf32>
    %14 = arith.maximumf %12, %13 : vector<8x128xf32>
    %c0_12 = arith.constant 0 : index
    %c0_13 = arith.constant 0 : index
    %15 = vector.load %arg6[%c0_12, %c0_13] : memref<128x32xf32, #tpu.memory_space<vmem>>, vector<128x32xf32>
    %cst_14 = arith.constant dense<0.000000e+00> : vector<8x32xf32>
    %16 = tpu.matmul %14, %15, %cst_14 {dimension_numbers = #tpu.dot_dimension_numbers<[1], [0], [0], [1], [0, 0, 1, 1], [], []>} : vector<8x128xf32>, vector<128x32xf32>, vector<8x32xf32> -> vector<8x32xf32>
    %c0_15 = arith.constant 0 : index
    %c0_16 = arith.constant 0 : index
    %17 = vector.load %arg7[%c0_15, %c0_16] : memref<1x32xf32, #tpu.memory_space<vmem>>, vector<1x32xf32>
    %18 = vector.broadcast %17 : vector<1x32xf32> to vector<8x32xf32>
    %19 = arith.addf %16, %18 : vector<8x32xf32>
    %cst_17 = arith.constant 0.000000e+00 : f32
    %cst_18 = arith.constant 1.000000e+00 : f32
    %20 = vector.broadcast %cst_17 : f32 to vector<8x32xf32>
    %21 = arith.maximumf %20, %19 : vector<8x32xf32>
    %22 = vector.broadcast %cst_18 : f32 to vector<8x32xf32>
    %23 = arith.minimumf %22, %21 : vector<8x32xf32>
    %c0_19 = arith.constant 0 : index
    %c0_20 = arith.constant 0 : index
    %24 = vector.load %arg8[%c0_19, %c0_20] : memref<8x32xf32, #tpu.memory_space<vmem>>, vector<8x32xf32>
    tpu.vector_store %arg8[%c0_19, %c0_20], %23 {strides = array<i32>} : memref<8x32xf32, #tpu.memory_space<vmem>>, vector<8x32xf32>,
    return
  }
  func.func @transform_0(%arg0: i32) -> (i32, i32) {
    %c0_i32 = arith.constant 0 : i32
    %c0_i32_0 = arith.constant 0 : i32
    return %arg0, %c0_i32 : i32, i32
  }
  func.func @transform_1(%arg0: i32) -> (i32, i32) {
    %c0_i32 = arith.constant 0 : i32
    %c0_i32_0 = arith.constant 0 : i32
    %c0_i32_1 = arith.constant 0 : i32
    return %c0_i32, %c0_i32_0 : i32, i32
  }
  func.func @transform_2(%arg0: i32) -> (i32, i32) {
    %c0_i32 = arith.constant 0 : i32
    %c0_i32_0 = arith.constant 0 : i32
    %c0_i32_1 = arith.constant 0 : i32
    return %c0_i32, %c0_i32_0 : i32, i32
  }
  func.func @transform_3(%arg0: i32) -> (i32, i32) {
    %c0_i32 = arith.constant 0 : i32
    %c0_i32_0 = arith.constant 0 : i32
    %c0_i32_1 = arith.constant 0 : i32
    return %c0_i32, %c0_i32_0 : i32, i32
  }
  func.func @transform_4(%arg0: i32) -> (i32, i32) {
    %c0_i32 = arith.constant 0 : i32
    %c0_i32_0 = arith.constant 0 : i32
    %c0_i32_1 = arith.constant 0 : i32
    return %c0_i32, %c0_i32_0 : i32, i32
  }
  func.func @transform_5(%arg0: i32) -> (i32, i32) {
    %c0_i32 = arith.constant 0 : i32
    %c0_i32_0 = arith.constant 0 : i32
    %c0_i32_1 = arith.constant 0 : i32
    return %c0_i32, %c0_i32_0 : i32, i32
  }
  func.func @transform_6(%arg0: i32) -> (i32, i32) {
    %c0_i32 = arith.constant 0 : i32
    %c0_i32_0 = arith.constant 0 : i32
    %c0_i32_1 = arith.constant 0 : i32
    return %c0_i32, %c0_i32_0 : i32, i32
  }
  func.func @transform_7(%arg0: i32) -> (i32, i32) {
    %c0_i32 = arith.constant 0 : i32
    %c0_i32_0 = arith.constant 0 : i32
    return %arg0, %c0_i32 : i32, i32
  }
}

</mosaic_0001>

<bundles_post_ra>
// kernel: mlp_forward.1
= control target key start
LH: loop header
LB: loop body
LE: loop exit
PB: predicated region body
PF: predicated region fallthrough
CT: control target
= control target key end

     0   :  { %12 = vsyncpa [#allocation3], 0  ;;  %s401_s0 = inlined_call_operand.vmem [shape: f32[8,64], index: 0, kind: input, shape index: {}]   ;;  %s402_s1 = inlined_call_operand.hbm [shape: f32[64,128], index: 1, kind: input, shape index: {}]   ;;  %s403_s2 = inlined_call_operand.vmem [shape: f32[1,128], index: 2, kind: input, shape index: {}]   ;;  %s404_s3 = inlined_call_operand.vmem [shape: f32[128,128], index: 3, kind: input, shape index: {}]   ;;  %s405_s4 = inlined_call_operand.vmem [shape: f32[1,128], index: 4, kind: input, shape index: {}]   ;;  %s406_s5 = inlined_call_operand.vmem [shape: f32[128,32], index: 5, kind: input, shape index: {}]   ;;  %s407_s6 = inlined_call_operand.vmem [shape: f32[1,32], index: 6, kind: input, shape index: {}]   ;;  %s408_s7 = inlined_call_operand.hbm [shape: f32[8,32], index: 7, kind: output, shape index: {}]  }
   0x1   :  { %13 = vsyncpa [#allocation4], 0  ;;  %s20_s26 = sshll.u32 %s402_s1, 4  ;;  %s243_s27 = smov [#allocation2]   ;;  %s21_s26 = int_to_ptr.hbm [resolvable:$true] %s20_s26 }
   0x2   :  { %s22_s28 = sshll.u32 %s243_s27, 4  ;;  %s244_s29 = smov 128   ;;  %s23_s28 = int_to_ptr.vmem [resolvable:$true] %s22_s28 }
   0x3   :  { %s245_s30 = smov 8  }
   0x4   :  { %28 = dma.hbm_to_vmem [thread:$0]  %s21_s26, 1024, %s23_s28, [#allocation3], %s244_s29, %s244_s29, %s245_s30  }
   0x5   :  { %239 = dma.done.wait [#allocation3], 1024  }
   0x6   :  { %240 = vsyncadd [#allocation3], 4294966272  ;;  %v51_v0 = vld [vmem:[#allocation2 + $0x38] sm:$0xff]  ;;  %v50_v1 = vld [vmem:[#allocation2 + $0x30] sm:$0xff]  ;;  %vm56_vm0 = vcmask 523264   ;;  %s246_s26 = smov [#allocation5]  }
   0x7   :  { %68 = vmatpush.msra.mxu0 %v51_v0  ;;  %v49_v2 = vld [vmem:[#allocation2 + $0x28] sm:$0xff]  ;;  %v96_v3 = vld [vmem:[%s404_s3 + $0x78] sm:$0xff]  ;;  %v95_v4 = vld [vmem:[%s404_s3 + $0x70] sm:$0xff]  ;;  %s171_s27 = sshll.u32 %s246_s26, 4  ;;  %vm164_vm1 = vcmask 261120   ;;  %s172_s27 = int_to_ptr.vmem [resolvable:$true] %s171_s27 }
   0x8   :  { %v48_v5 = vld [vmem:[#allocation2 + $0x20] sm:$0xff]  ;;  %101 = vmatpush.msra.mxu1 %v96_v3  ;;  %v94_v6 = vld [vmem:[%s404_s3 + $0x68] sm:$0xff]  ;;  %v47_v7 = vld [vmem:[#allocation2 + $0x18] sm:$0xff] }
   0x9   :  { %69 = vmatpush.msra.mxu0 %v50_v1  ;;  %v93_v8 = vld [vmem:[%s404_s3 + $0x60] sm:$0xff]  ;;  %v46_v9 = vld [vmem:[#allocation2 + $0x10] sm:$0xff]  ;;  %v92_v10 = vld [vmem:[%s404_s3 + $0x58] sm:$0xff] }
   0xa   :  { %102 = vmatpush.msra.mxu1 %v95_v4  ;;  %v45_v11 = vld [vmem:[#allocation2 + $0x8] sm:$0xff]  ;;  %v91_v12 = vld [vmem:[%s404_s3 + $0x50] sm:$0xff]  ;;  %v44_v13 = vld [vmem:[#allocation2] sm:$0xff] }
   0xb   :  { %70 = vmatpush.msra.mxu0 %v49_v2  ;;  %v43_v14 = vld [vmem:[%s401_s0] sm:$0xff]  ;;  %v90_v15 = vld [vmem:[%s404_s3 + $0x48] sm:$0xff]  ;;  %v88_v17 = vld [vmem:[%s404_s3 + $0x38] sm:$0xff] }
   0xc   :  { %103 = vmatpush.msra.mxu1 %v94_v6  ;;  %v89_v16 = vld [vmem:[%s404_s3 + $0x40] sm:$0xff]  ;;  %v87_v18 = vld [vmem:[%s404_s3 + $0x30] sm:$0xff]  ;;  %v86_v19 = vld [vmem:[%s404_s3 + $0x28] sm:$0xff] }
   0xd   :  { %71 = vmatpush.msra.mxu0 %v48_v5  ;;  %v85_v20 = vld [vmem:[%s404_s3 + $0x20] sm:$0xff]  ;;  %v84_v21 = vld [vmem:[%s404_s3 + $0x18] sm:$0xff]  ;;  %v83_v22 = vld [vmem:[%s404_s3 + $0x10] sm:$0xff] }
   0xe   :  { %104 = vmatpush.msra.mxu1 %v93_v8  ;;  %v82_v23 = vld [vmem:[%s404_s3 + $0x8] sm:$0xff]  ;;  %v81_v24 = vld [vmem:[%s404_s3] sm:$0xff]  ;;  %v137_v25 = vld [vmem:[%s406_s5 + $0x78] sm:$0xff] }
   0xf   :  { %72 = vmatpush.msra.mxu0 %v47_v7  ;;  %v136_v26 = vld [vmem:[%s406_s5 + $0x70] sm:$0xff]  ;;  %142 = vmatpush.msra.mxu2 %v137_v25  ;;  %v135_v27 = vld [vmem:[%s406_s5 + $0x68] sm:$0xff]  ;;  %v134_v28 = vld [vmem:[%s406_s5 + $0x60] sm:$0xff] }
  0x10   :  { %105 = vmatpush.msra.mxu1 %v92_v10  ;;  %v133_v29 = vld [vmem:[%s406_s5 + $0x58] sm:$0xff]  ;;  %v132_v30 = vld [vmem:[%s406_s5 + $0x50] sm:$0xff]  ;;  %v131_v31 = vld [vmem:[%s406_s5 + $0x48] sm:$0xff] }
  0x11   :  { %73 = vmatpush.msra.mxu0 %v46_v9  ;;  %143 = vmatpush.msra.mxu2 %v136_v26  ;;  %v130_v32 = vld [vmem:[%s406_s5 + $0x40] sm:$0xff]  ;;  %v129_v33 = vld [vmem:[%s406_s5 + $0x38] sm:$0xff]  ;;  %v128_v34 = vld [vmem:[%s406_s5 + $0x30] sm:$0xff] }
  0x12   :  { %106 = vmatpush.msra.mxu1 %v91_v12  ;;  %v127_v35 = vld [vmem:[%s406_s5 + $0x28] sm:$0xff]  ;;  %v126_v36 = vld [vmem:[%s406_s5 + $0x20] sm:$0xff]  ;;  %v125_v37 = vld [vmem:[%s406_s5 + $0x18] sm:$0xff] }
  0x13   :  { %74 = vmatpush.msra.mxu0 %v45_v11  ;;  %144 = vmatpush.msra.mxu2 %v135_v27  ;;  %v188_v38 = vld [vmem:[%s403_s2] ss:$0 sm:$0xff]  ;;  %v124_v42 = vld [vmem:[%s406_s5 + $0x10] sm:$0xff]  ;;  %v123_v43 = vld [vmem:[%s406_s5 + $0x8] sm:$0xff] }
  0x14   :  { %107 = vmatpush.msra.mxu1 %v90_v15  ;;  %v122_v44 = vld [vmem:[%s406_s5] sm:$0xff]  ;;  %s173_s5 = sshll.u32 %s408_s7, 4  ;;  %s174_s5 = int_to_ptr.hbm [resolvable:$true] %s173_s5 }
  0x15   :  { %75 = vmatpush.msra.mxu0 %v44_v13  ;;  %145 = vmatpush.msra.mxu2 %v134_v28  ;;  %v189_v45 = vld [vmem:[%s405_s4] ss:$0 sm:$0xff] }
  0x16   :  { %183 = vmatmul.msk.f32.vlgmr.msra.gmra.mxu0 %vm56_vm0, %v43_v14  ;;  %108 = vmatpush.msra.mxu1 %v89_v16  ;;  %v190_v49 = vld [vmem:[%s407_s6] ss:$0 sm:$0xff] }
  0x17   :  { %146 = vmatpush.msra.mxu2 %v133_v29 }
  0x18   :  { %109 = vmatpush.msra.mxu1 %v88_v17 }
  0x19   :  { %147 = vmatpush.msra.mxu2 %v132_v30 }
  0x1a   :  { %110 = vmatpush.msra.mxu1 %v87_v18 }
  0x1b   :  { %148 = vmatpush.msra.mxu2 %v131_v31 }
  0x1c   :  { %111 = vmatpush.msra.mxu1 %v86_v19 }
  0x1d   :  { %149 = vmatpush.msra.mxu2 %v130_v32 }
  0x1e   :  { %112 = vmatpush.msra.mxu1 %v85_v20 }
  0x1f   :  { %150 = vmatpush.msra.mxu2 %v129_v33 }
  0x20   :  { %113 = vmatpush.msra.mxu1 %v84_v21 }
  0x21   :  { %151 = vmatpush.msra.mxu2 %v128_v34 }
  0x22   :  { %114 = vmatpush.msra.mxu1 %v83_v22 }
  0x23   :  { %152 = vmatpush.msra.mxu2 %v127_v35 }
  0x24   :  { %115 = vmatpush.msra.mxu1 %v82_v23 }
  0x25   :  { %153 = vmatpush.msra.mxu2 %v126_v36 }
  0x26   :  { %116 = vmatpush.msra.mxu1 %v81_v24 }
  0x27   :  { %154 = vmatpush.msra.mxu2 %v125_v37 }
  0x29   :  { %155 = vmatpush.msra.mxu2 %v124_v42 }
  0x2b   :  { %156 = vmatpush.msra.mxu2 %v123_v43 }
  0x2d   :  { %157 = vmatpush.msra.mxu2 %v122_v44 }
  0x93   :  { %v77_v39 = vpop.f32.mrf.mxu0 }
  0x94   :  { %v78_v40 = vadd.f32 %v188_v38, %v77_v39 }
  0x96   :  { %v80_v41 = vmax.f32 %v78_v40, 0.0 }
  0x98   :  { %117 = vmatmul.f32.vlgmr.msra.gmra.mxu1 %v80_v41 }
 0x115   :  { %v118_v46 = vpop.f32.mrf.mxu1 }
 0x116   :  { %v119_v47 = vadd.f32 %v189_v45, %v118_v46 }
 0x118   :  { %v121_v48 = vmax.f32 %v119_v47, 0.0 }
 0x11a   :  { %158 = vmatmul.f32.vlgmr.msra.gmra.mxu2 %v121_v48 }
 0x19d   :  { %v159_v50 = vpop.f32.mrf.mxu2 }
 0x19e   :  { %v160_v51 = vadd.f32 %v190_v49, %v159_v50 }
 0x1a0   :  { %v162_v52 = vmax.f32 %v160_v51, 0.0 }
 0x1a2   :  { %v163_v53 = vmin.f32 %v162_v52, 1.0 }
 0x1a4   :  { %165 = vst.msk [vmem:[#allocation5] sm:$0xff] %vm164_vm1, %v163_v53 }
 0x1a5   :  { %176 = dma.vmem_to_hbm [thread:$0]  %s172_s27, 128, %s174_s5, [#allocation4]  }
 0x1a6   :  { %241 = dma.done.wait [#allocation4], 128  }
 0x1a7   :  { %242 = vsyncadd [#allocation4], 4294967168 }
 0x1a8   :  { %181 = vsyncpa [#allocation3], 1 }
 0x1a9   :  { %182 = vsyncpa [#allocation4], 1 }

</bundles_post_ra>
